<compile_context>
chip_gen: v5e
topology: v5e:2x2
jax: 0.10.0
libtpu: 0.0.40
codegen_flags: <defaults>
</compile_context>

<pallas_src>
import math

import jax
import jax.numpy as jnp
from jax.experimental import pallas as pl
from jax.experimental.pallas import tpu as pltpu

SH_C0 = 0.28209479177387814
SH_C1 = 0.4886025119029199
SH_C2 = [1.0925484305920792, -1.0925484305920792, 0.31539156525252005,
         -1.0925484305920792, 0.5462742152960396]
SH_C3 = [-0.5900435899266435, 2.890611442640554, -0.4570457994644658,
         0.3731763325901154, -0.4570457994644658, 1.445305721320277,
         -0.5900435899266435]
SH_C4 = [2.5033429417967046, -1.7701307697799304, 0.9461746957575601,
         -0.6690465435572892, 0.10578554691520431, -0.6690465435572892,
         0.47308734787878004, -1.7701307697799304, 0.6258357354491761]

_LANES = 128


def _make_sh_kernel(basis_dim: int):
    """Elementwise SH-basis kernel for a static basis_dim.

    Inputs x/y/z are (block_rows, 128) tiles (points dense on sublanes+lanes);
    output is (basis_dim, block_rows, 128).  Each basis row is stored as soon
    as it is computed (lane-dense, unmasked 128-wide stores).
    """

    def kernel(x_ref, y_ref, z_ref, o_ref):
        odt = o_ref.dtype
        # Compute in f32 regardless of input dtype (bf16-safe on v5e).
        x = x_ref[...].astype(jnp.float32)
        y = y_ref[...].astype(jnp.float32)
        z = z_ref[...].astype(jnp.float32)

        def st(k, v):
            o_ref[k, :, :] = v.astype(odt)

        st(0, jnp.full_like(x, SH_C0))
        if basis_dim > 1:
            st(1, -SH_C1 * y)
            st(2, SH_C1 * z)
            st(3, -SH_C1 * x)
            if basis_dim > 4:
                xx, yy, zz = x * x, y * y, z * z
                xy, yz, xz = x * y, y * z, x * z
                xx_m_yy = xx - yy
                st(4, SH_C2[0] * xy)
                st(5, SH_C2[1] * yz)
                st(6, SH_C2[2] * (2.0 * zz - xx - yy))
                st(7, SH_C2[3] * xz)
                st(8, SH_C2[4] * xx_m_yy)
                if basis_dim > 9:
                    # hoisted shared subexpressions (used 2-3x below)
                    three_xx_m_yy = 3.0 * xx - yy
                    xx_m_3yy = xx - 3.0 * yy
                    fzz = 4.0 * zz - xx - yy
                    st(9, SH_C3[0] * y * three_xx_m_yy)
                    st(10, SH_C3[1] * xy * z)
                    st(11, SH_C3[2] * y * fzz)
                    st(12, SH_C3[3] * z * (2.0 * zz - 3.0 * xx - 3.0 * yy))
                    st(13, SH_C3[4] * x * fzz)
                    st(14, SH_C3[5] * z * xx_m_yy)
                    st(15, SH_C3[6] * x * xx_m_3yy)
                    if basis_dim > 16:
                        szz1 = 7.0 * zz - 1.0
                        szz3 = 7.0 * zz - 3.0
                        st(16, SH_C4[0] * xy * xx_m_yy)
                        st(17, SH_C4[1] * yz * three_xx_m_yy)
                        st(18, SH_C4[2] * xy * szz1)
                        st(19, SH_C4[3] * yz * szz3)
                        st(20, SH_C4[4] * (zz * (35.0 * zz - 30.0) + 3.0))
                        st(21, SH_C4[5] * xz * szz3)
                        st(22, SH_C4[6] * xx_m_yy * szz1)
                        st(23, SH_C4[7] * xz * xx_m_3yy)
                        st(24, SH_C4[8] * (xx * xx_m_3yy - yy * three_xx_m_yy))

    return kernel


def spherical_harmonics_encoding(dirs: jax.Array, sh_degree: int = 4,
                                 block_rows: int = 128,
                                 channels_first: bool = False) -> jax.Array:
    """Evaluate SH bases at unit directions.

    dirs: (..., 3)  ->  (..., sh_degree**2)          (channels_first=False)
                    ->  (sh_degree**2, ...)          (channels_first=True,
                                                      avoids the output transpose)
    """
    assert 0 <= sh_degree <= 5
    basis_dim = sh_degree ** 2
    batch_shape = dirs.shape[:-1]
    assert dirs.shape[-1] == 3

    if basis_dim == 0:
        if channels_first:
            return jnp.zeros((0,) + batch_shape, dtype=dirs.dtype)
        return jnp.zeros(batch_shape + (0,), dtype=dirs.dtype)

    n = math.prod(batch_shape) if batch_shape else 1
    d = dirs.reshape(n, 3)

    # Split channels and pad the point axis up to a multiple of 128 lanes
    # (cheap: input is ~3/19 of total traffic).
    rows = pl.cdiv(n, _LANES)
    n_pad = rows * _LANES
    x, y, z = d[:, 0], d[:, 1], d[:, 2]
    if n_pad != n:
        pad = (0, n_pad - n)
        x, y, z = jnp.pad(x, pad), jnp.pad(y, pad), jnp.pad(z, pad)
    x = x.reshape(rows, _LANES)
    y = y.reshape(rows, _LANES)
    z = z.reshape(rows, _LANES)

    # Tile size: block_rows*128 points per grid step.  For small inputs use
    # the whole array as a single block (block dim == full dim is allowed).
    br = block_rows if rows >= block_rows else rows
    grid = (pl.cdiv(rows, br),)

    in_spec = pl.BlockSpec((br, _LANES), lambda i: (i, 0))
    out_spec = pl.BlockSpec((basis_dim, br, _LANES), lambda i: (0, i, 0))

    out_cf = pl.pallas_call(
        _make_sh_kernel(basis_dim),
        out_shape=jax.ShapeDtypeStruct((basis_dim, rows, _LANES), dirs.dtype),
        grid=grid,
        in_specs=[in_spec, in_spec, in_spec],
        out_specs=out_spec,
        compiler_params=pltpu.CompilerParams(
            dimension_semantics=("parallel",)),   # megacore sharding on v7x
    )(x, y, z)

    out_cf = out_cf.reshape(basis_dim, n_pad)[:, :n]   # (basis_dim, N)
    if channels_first:
        return out_cf.reshape((basis_dim,) + batch_shape)
    # PyTorch-compatible point-major layout (one extra HBM pass).
    return out_cf.T.reshape(batch_shape + (basis_dim,))


def _reference_sh(dirs: jax.Array, sh_degree: int = 4) -> jax.Array:
    """Pure-JAX reference mirroring the PyTorch forward (for verification)."""
    basis_dim = sh_degree ** 2
    x, y, z = dirs[..., 0], dirs[..., 1], dirs[..., 2]
    cols = [jnp.full_like(x, SH_C0)]
    if basis_dim > 1:
        cols += [-SH_C1 * y, SH_C1 * z, -SH_C1 * x]
        if basis_dim > 4:
            xx, yy, zz = x * x, y * y, z * z
            xy, yz, xz = x * y, y * z, x * z
            cols += [SH_C2[0] * xy, SH_C2[1] * yz,
                     SH_C2[2] * (2.0 * zz - xx - yy),
                     SH_C2[3] * xz, SH_C2[4] * (xx - yy)]
            if basis_dim > 9:
                cols += [SH_C3[0] * y * (3 * xx - yy),
                         SH_C3[1] * xy * z,
                         SH_C3[2] * y * (4 * zz - xx - yy),
                         SH_C3[3] * z * (2 * zz - 3 * xx - 3 * yy),
                         SH_C3[4] * x * (4 * zz - xx - yy),
                         SH_C3[5] * z * (xx - yy),
                         SH_C3[6] * x * (xx - 3 * yy)]
                if basis_dim > 16:
                    cols += [SH_C4[0] * xy * (xx - yy),
                             SH_C4[1] * yz * (3 * xx - yy),
                             SH_C4[2] * xy * (7 * zz - 1),
                             SH_C4[3] * yz * (7 * zz - 3),
                             SH_C4[4] * (zz * (35 * zz - 30) + 3),
                             SH_C4[5] * xz * (7 * zz - 3),
                             SH_C4[6] * (xx - yy) * (7 * zz - 1),
                             SH_C4[7] * xz * (xx - 3 * yy),
                             SH_C4[8] * (xx * (xx - 3 * yy) - yy * (3 * xx - yy))]
    return jnp.stack(cols, axis=-1)


if __name__ == "__main__":
    key = jax.random.PRNGKey(0)

    # Main check: batch=2, seq=64 unit directions -> (2, 64, 16) for sh_degree=4.
    raw = jax.random.normal(key, (2, 64, 3), dtype=jnp.float32)
    dirs = raw / jnp.linalg.norm(raw, axis=-1, keepdims=True)

    out = spherical_harmonics_encoding(dirs, sh_degree=4)
    out = jax.block_until_ready(out)
    ref = _reference_sh(dirs, sh_degree=4)
    assert out.shape == ref.shape == (2, 64, 16), out.shape
    assert out.dtype == dirs.dtype
    assert jnp.allclose(out, ref, atol=1e-6, rtol=1e-6)

    # Extra coverage: degree 5 (25 bases) with a ragged point count, degree 1.
    raw2 = jax.random.normal(jax.random.PRNGKey(1), (33, 3), dtype=jnp.float32)
    dirs2 = raw2 / jnp.linalg.norm(raw2, axis=-1, keepdims=True)
    for deg in (1, 5):
        o = jax.block_until_ready(spherical_harmonics_encoding(dirs2, sh_degree=deg))
        r = _reference_sh(dirs2, sh_degree=deg)
        assert o.shape == r.shape == (33, deg ** 2), (deg, o.shape)
        assert jnp.allclose(o, r, atol=1e-6, rtol=1e-6), deg

    # Channels-first path (no output transpose) must match too.
    o_cf = jax.block_until_ready(
        spherical_harmonics_encoding(dirs, sh_degree=4, channels_first=True))
    assert o_cf.shape == (16, 2, 64)
    assert jnp.allclose(jnp.moveaxis(o_cf, 0, -1), ref, atol=1e-6, rtol=1e-6)

    print("KERNEL_OK")
</pallas_src>

<mosaic_0001>
module attributes {stable_mosaic.version = 11 : i64} {
  func.func @kernel(%arg0: i32, %arg1: memref<1x128xf32, #tpu.memory_space<vmem>>, %arg2: memref<1x128xf32, #tpu.memory_space<vmem>>, %arg3: memref<1x128xf32, #tpu.memory_space<vmem>>, %arg4: memref<16x1x128xf32, #tpu.memory_space<vmem>>) attributes {dimension_semantics = [#tpu.dimension_semantics<parallel>], iteration_bounds = array<i64: 1>, scalar_prefetch = 0 : i64, scratch_operands = 0 : i64, tpu.core_type = #tpu.core_type<tc>, window_params = [{transform_indices = @transform_0, window_bounds = array<i64: 1, 128>}, {transform_indices = @transform_1, window_bounds = array<i64: 1, 128>}, {transform_indices = @transform_2, window_bounds = array<i64: 1, 128>}, {transform_indices = @transform_3, window_bounds = array<i64: 16, 1, 128>}]} {
    %c0 = arith.constant 0 : index
    %c0_0 = arith.constant 0 : index
    %0 = vector.load %arg1[%c0, %c0_0] : memref<1x128xf32, #tpu.memory_space<vmem>>, vector<1x128xf32>
    %c0_1 = arith.constant 0 : index
    %c0_2 = arith.constant 0 : index
    %1 = vector.load %arg2[%c0_1, %c0_2] : memref<1x128xf32, #tpu.memory_space<vmem>>, vector<1x128xf32>
    %c0_3 = arith.constant 0 : index
    %c0_4 = arith.constant 0 : index
    %2 = vector.load %arg3[%c0_3, %c0_4] : memref<1x128xf32, #tpu.memory_space<vmem>>, vector<1x128xf32>
    %cst = arith.constant 0.282094806 : f32
    %3 = vector.broadcast %cst : f32 to vector<1x128xf32>
    %c0_5 = arith.constant 0 : index
    %c0_6 = arith.constant 0 : index
    %c0_7 = arith.constant 0 : index
    %4 = vector.load %arg4[%c0_5, %c0_6, %c0_7] : memref<16x1x128xf32, #tpu.memory_space<vmem>>, vector<1x1x128xf32>
    %5 = vector.shape_cast %4 : vector<1x1x128xf32> to vector<1x128xf32>
    %6 = vector.shape_cast %3 : vector<1x128xf32> to vector<1x1x128xf32>
    tpu.vector_store %arg4[%c0_5, %c0_6, %c0_7], %6 {strides = array<i32>} : memref<16x1x128xf32, #tpu.memory_space<vmem>>, vector<1x1x128xf32>,
    %cst_8 = arith.constant -0.488602519 : f32
    %7 = vector.broadcast %cst_8 : f32 to vector<1x128xf32>
    %8 = arith.mulf %7, %1 : vector<1x128xf32>
    %c1 = arith.constant 1 : index
    %c0_9 = arith.constant 0 : index
    %c0_10 = arith.constant 0 : index
    %9 = vector.load %arg4[%c1, %c0_9, %c0_10] : memref<16x1x128xf32, #tpu.memory_space<vmem>>, vector<1x1x128xf32>
    %10 = vector.shape_cast %9 : vector<1x1x128xf32> to vector<1x128xf32>
    %11 = vector.shape_cast %8 : vector<1x128xf32> to vector<1x1x128xf32>
    tpu.vector_store %arg4[%c1, %c0_9, %c0_10], %11 {strides = array<i32>} : memref<16x1x128xf32, #tpu.memory_space<vmem>>, vector<1x1x128xf32>,
    %cst_11 = arith.constant 0.488602519 : f32
    %12 = vector.broadcast %cst_11 : f32 to vector<1x128xf32>
    %13 = arith.mulf %12, %2 : vector<1x128xf32>
    %c2 = arith.constant 2 : index
    %c0_12 = arith.constant 0 : index
    %c0_13 = arith.constant 0 : index
    %14 = vector.load %arg4[%c2, %c0_12, %c0_13] : memref<16x1x128xf32, #tpu.memory_space<vmem>>, vector<1x1x128xf32>
    %15 = vector.shape_cast %14 : vector<1x1x128xf32> to vector<1x128xf32>
    %16 = vector.shape_cast %13 : vector<1x128xf32> to vector<1x1x128xf32>
    tpu.vector_store %arg4[%c2, %c0_12, %c0_13], %16 {strides = array<i32>} : memref<16x1x128xf32, #tpu.memory_space<vmem>>, vector<1x1x128xf32>,
    %cst_14 = arith.constant -0.488602519 : f32
    %17 = vector.broadcast %cst_14 : f32 to vector<1x128xf32>
    %18 = arith.mulf %17, %0 : vector<1x128xf32>
    %c3 = arith.constant 3 : index
    %c0_15 = arith.constant 0 : index
    %c0_16 = arith.constant 0 : index
    %19 = vector.load %arg4[%c3, %c0_15, %c0_16] : memref<16x1x128xf32, #tpu.memory_space<vmem>>, vector<1x1x128xf32>
    %20 = vector.shape_cast %19 : vector<1x1x128xf32> to vector<1x128xf32>
    %21 = vector.shape_cast %18 : vector<1x128xf32> to vector<1x1x128xf32>
    tpu.vector_store %arg4[%c3, %c0_15, %c0_16], %21 {strides = array<i32>} : memref<16x1x128xf32, #tpu.memory_space<vmem>>, vector<1x1x128xf32>,
    %22 = arith.mulf %0, %0 : vector<1x128xf32>
    %23 = arith.mulf %1, %1 : vector<1x128xf32>
    %24 = arith.mulf %2, %2 : vector<1x128xf32>
    %25 = arith.mulf %0, %1 : vector<1x128xf32>
    %26 = arith.mulf %1, %2 : vector<1x128xf32>
    %27 = arith.mulf %0, %2 : vector<1x128xf32>
    %28 = arith.subf %22, %23 : vector<1x128xf32>
    %cst_17 = arith.constant 1.09254849 : f32
    %29 = vector.broadcast %cst_17 : f32 to vector<1x128xf32>
    %30 = arith.mulf %29, %25 : vector<1x128xf32>
    %c4 = arith.constant 4 : index
    %c0_18 = arith.constant 0 : index
    %c0_19 = arith.constant 0 : index
    %31 = vector.load %arg4[%c4, %c0_18, %c0_19] : memref<16x1x128xf32, #tpu.memory_space<vmem>>, vector<1x1x128xf32>
    %32 = vector.shape_cast %31 : vector<1x1x128xf32> to vector<1x128xf32>
    %33 = vector.shape_cast %30 : vector<1x128xf32> to vector<1x1x128xf32>
    tpu.vector_store %arg4[%c4, %c0_18, %c0_19], %33 {strides = array<i32>} : memref<16x1x128xf32, #tpu.memory_space<vmem>>, vector<1x1x128xf32>,
    %cst_20 = arith.constant -1.09254849 : f32
    %34 = vector.broadcast %cst_20 : f32 to vector<1x128xf32>
    %35 = arith.mulf %34, %26 : vector<1x128xf32>
    %c5 = arith.constant 5 : index
    %c0_21 = arith.constant 0 : index
    %c0_22 = arith.constant 0 : index
    %36 = vector.load %arg4[%c5, %c0_21, %c0_22] : memref<16x1x128xf32, #tpu.memory_space<vmem>>, vector<1x1x128xf32>
    %37 = vector.shape_cast %36 : vector<1x1x128xf32> to vector<1x128xf32>
    %38 = vector.shape_cast %35 : vector<1x128xf32> to vector<1x1x128xf32>
    tpu.vector_store %arg4[%c5, %c0_21, %c0_22], %38 {strides = array<i32>} : memref<16x1x128xf32, #tpu.memory_space<vmem>>, vector<1x1x128xf32>,
    %cst_23 = arith.constant 2.000000e+00 : f32
    %39 = vector.broadcast %cst_23 : f32 to vector<1x128xf32>
    %40 = arith.mulf %39, %24 : vector<1x128xf32>
    %41 = arith.subf %40, %22 : vector<1x128xf32>
    %42 = arith.subf %41, %23 : vector<1x128xf32>
    %cst_24 = arith.constant 0.31539157 : f32
    %43 = vector.broadcast %cst_24 : f32 to vector<1x128xf32>
    %44 = arith.mulf %43, %42 : vector<1x128xf32>
    %c6 = arith.constant 6 : index
    %c0_25 = arith.constant 0 : index
    %c0_26 = arith.constant 0 : index
    %45 = vector.load %arg4[%c6, %c0_25, %c0_26] : memref<16x1x128xf32, #tpu.memory_space<vmem>>, vector<1x1x128xf32>
    %46 = vector.shape_cast %45 : vector<1x1x128xf32> to vector<1x128xf32>
    %47 = vector.shape_cast %44 : vector<1x128xf32> to vector<1x1x128xf32>
    tpu.vector_store %arg4[%c6, %c0_25, %c0_26], %47 {strides = array<i32>} : memref<16x1x128xf32, #tpu.memory_space<vmem>>, vector<1x1x128xf32>,
    %cst_27 = arith.constant -1.09254849 : f32
    %48 = vector.broadcast %cst_27 : f32 to vector<1x128xf32>
    %49 = arith.mulf %48, %27 : vector<1x128xf32>
    %c7 = arith.constant 7 : index
    %c0_28 = arith.constant 0 : index
    %c0_29 = arith.constant 0 : index
    %50 = vector.load %arg4[%c7, %c0_28, %c0_29] : memref<16x1x128xf32, #tpu.memory_space<vmem>>, vector<1x1x128xf32>
    %51 = vector.shape_cast %50 : vector<1x1x128xf32> to vector<1x128xf32>
    %52 = vector.shape_cast %49 : vector<1x128xf32> to vector<1x1x128xf32>
    tpu.vector_store %arg4[%c7, %c0_28, %c0_29], %52 {strides = array<i32>} : memref<16x1x128xf32, #tpu.memory_space<vmem>>, vector<1x1x128xf32>,
    %cst_30 = arith.constant 0.546274245 : f32
    %53 = vector.broadcast %cst_30 : f32 to vector<1x128xf32>
    %54 = arith.mulf %53, %28 : vector<1x128xf32>
    %c8 = arith.constant 8 : index
    %c0_31 = arith.constant 0 : index
    %c0_32 = arith.constant 0 : index
    %55 = vector.load %arg4[%c8, %c0_31, %c0_32] : memref<16x1x128xf32, #tpu.memory_space<vmem>>, vector<1x1x128xf32>
    %56 = vector.shape_cast %55 : vector<1x1x128xf32> to vector<1x128xf32>
    %57 = vector.shape_cast %54 : vector<1x128xf32> to vector<1x1x128xf32>
    tpu.vector_store %arg4[%c8, %c0_31, %c0_32], %57 {strides = array<i32>} : memref<16x1x128xf32, #tpu.memory_space<vmem>>, vector<1x1x128xf32>,
    %cst_33 = arith.constant 3.000000e+00 : f32
    %58 = vector.broadcast %cst_33 : f32 to vector<1x128xf32>
    %59 = arith.mulf %58, %22 : vector<1x128xf32>
    %60 = arith.subf %59, %23 : vector<1x128xf32>
    %cst_34 = arith.constant 3.000000e+00 : f32
    %61 = vector.broadcast %cst_34 : f32 to vector<1x128xf32>
    %62 = arith.mulf %61, %23 : vector<1x128xf32>
    %63 = arith.subf %22, %62 : vector<1x128xf32>
    %cst_35 = arith.constant 4.000000e+00 : f32
    %64 = vector.broadcast %cst_35 : f32 to vector<1x128xf32>
    %65 = arith.mulf %64, %24 : vector<1x128xf32>
    %66 = arith.subf %65, %22 : vector<1x128xf32>
    %67 = arith.subf %66, %23 : vector<1x128xf32>
    %cst_36 = arith.constant -0.590043604 : f32
    %68 = vector.broadcast %cst_36 : f32 to vector<1x128xf32>
    %69 = arith.mulf %68, %1 : vector<1x128xf32>
    %70 = arith.mulf %69, %60 : vector<1x128xf32>
    %c9 = arith.constant 9 : index
    %c0_37 = arith.constant 0 : index
    %c0_38 = arith.constant 0 : index
    %71 = vector.load %arg4[%c9, %c0_37, %c0_38] : memref<16x1x128xf32, #tpu.memory_space<vmem>>, vector<1x1x128xf32>
    %72 = vector.shape_cast %71 : vector<1x1x128xf32> to vector<1x128xf32>
    %73 = vector.shape_cast %70 : vector<1x128xf32> to vector<1x1x128xf32>
    tpu.vector_store %arg4[%c9, %c0_37, %c0_38], %73 {strides = array<i32>} : memref<16x1x128xf32, #tpu.memory_space<vmem>>, vector<1x1x128xf32>,
    %cst_39 = arith.constant 2.89061141 : f32
    %74 = vector.broadcast %cst_39 : f32 to vector<1x128xf32>
    %75 = arith.mulf %74, %25 : vector<1x128xf32>
    %76 = arith.mulf %75, %2 : vector<1x128xf32>
    %c10 = arith.constant 10 : index
    %c0_40 = arith.constant 0 : index
    %c0_41 = arith.constant 0 : index
    %77 = vector.load %arg4[%c10, %c0_40, %c0_41] : memref<16x1x128xf32, #tpu.memory_space<vmem>>, vector<1x1x128xf32>
    %78 = vector.shape_cast %77 : vector<1x1x128xf32> to vector<1x128xf32>
    %79 = vector.shape_cast %76 : vector<1x128xf32> to vector<1x1x128xf32>
    tpu.vector_store %arg4[%c10, %c0_40, %c0_41], %79 {strides = array<i32>} : memref<16x1x128xf32, #tpu.memory_space<vmem>>, vector<1x1x128xf32>,
    %cst_42 = arith.constant -0.457045794 : f32
    %80 = vector.broadcast %cst_42 : f32 to vector<1x128xf32>
    %81 = arith.mulf %80, %1 : vector<1x128xf32>
    %82 = arith.mulf %81, %67 : vector<1x128xf32>
    %c11 = arith.constant 11 : index
    %c0_43 = arith.constant 0 : index
    %c0_44 = arith.constant 0 : index
    %83 = vector.load %arg4[%c11, %c0_43, %c0_44] : memref<16x1x128xf32, #tpu.memory_space<vmem>>, vector<1x1x128xf32>
    %84 = vector.shape_cast %83 : vector<1x1x128xf32> to vector<1x128xf32>
    %85 = vector.shape_cast %82 : vector<1x128xf32> to vector<1x1x128xf32>
    tpu.vector_store %arg4[%c11, %c0_43, %c0_44], %85 {strides = array<i32>} : memref<16x1x128xf32, #tpu.memory_space<vmem>>, vector<1x1x128xf32>,
    %cst_45 = arith.constant 0.373176336 : f32
    %86 = vector.broadcast %cst_45 : f32 to vector<1x128xf32>
    %87 = arith.mulf %86, %2 : vector<1x128xf32>
    %cst_46 = arith.constant 2.000000e+00 : f32
    %88 = vector.broadcast %cst_46 : f32 to vector<1x128xf32>
    %89 = arith.mulf %88, %24 : vector<1x128xf32>
    %cst_47 = arith.constant 3.000000e+00 : f32
    %90 = vector.broadcast %cst_47 : f32 to vector<1x128xf32>
    %91 = arith.mulf %90, %22 : vector<1x128xf32>
    %92 = arith.subf %89, %91 : vector<1x128xf32>
    %cst_48 = arith.constant 3.000000e+00 : f32
    %93 = vector.broadcast %cst_48 : f32 to vector<1x128xf32>
    %94 = arith.mulf %93, %23 : vector<1x128xf32>
    %95 = arith.subf %92, %94 : vector<1x128xf32>
    %96 = arith.mulf %87, %95 : vector<1x128xf32>
    %c12 = arith.constant 12 : index
    %c0_49 = arith.constant 0 : index
    %c0_50 = arith.constant 0 : index
    %97 = vector.load %arg4[%c12, %c0_49, %c0_50] : memref<16x1x128xf32, #tpu.memory_space<vmem>>, vector<1x1x128xf32>
    %98 = vector.shape_cast %97 : vector<1x1x128xf32> to vector<1x128xf32>
    %99 = vector.shape_cast %96 : vector<1x128xf32> to vector<1x1x128xf32>
    tpu.vector_store %arg4[%c12, %c0_49, %c0_50], %99 {strides = array<i32>} : memref<16x1x128xf32, #tpu.memory_space<vmem>>, vector<1x1x128xf32>,
    %cst_51 = arith.constant -0.457045794 : f32
    %100 = vector.broadcast %cst_51 : f32 to vector<1x128xf32>
    %101 = arith.mulf %100, %0 : vector<1x128xf32>
    %102 = arith.mulf %101, %67 : vector<1x128xf32>
    %c13 = arith.constant 13 : index
    %c0_52 = arith.constant 0 : index
    %c0_53 = arith.constant 0 : index
    %103 = vector.load %arg4[%c13, %c0_52, %c0_53] : memref<16x1x128xf32, #tpu.memory_space<vmem>>, vector<1x1x128xf32>
    %104 = vector.shape_cast %103 : vector<1x1x128xf32> to vector<1x128xf32>
    %105 = vector.shape_cast %102 : vector<1x128xf32> to vector<1x1x128xf32>
    tpu.vector_store %arg4[%c13, %c0_52, %c0_53], %105 {strides = array<i32>} : memref<16x1x128xf32, #tpu.memory_space<vmem>>, vector<1x1x128xf32>,
    %cst_54 = arith.constant 1.44530571 : f32
    %106 = vector.broadcast %cst_54 : f32 to vector<1x128xf32>
    %107 = arith.mulf %106, %2 : vector<1x128xf32>
    %108 = arith.mulf %107, %28 : vector<1x128xf32>
    %c14 = arith.constant 14 : index
    %c0_55 = arith.constant 0 : index
    %c0_56 = arith.constant 0 : index
    %109 = vector.load %arg4[%c14, %c0_55, %c0_56] : memref<16x1x128xf32, #tpu.memory_space<vmem>>, vector<1x1x128xf32>
    %110 = vector.shape_cast %109 : vector<1x1x128xf32> to vector<1x128xf32>
    %111 = vector.shape_cast %108 : vector<1x128xf32> to vector<1x1x128xf32>
    tpu.vector_store %arg4[%c14, %c0_55, %c0_56], %111 {strides = array<i32>} : memref<16x1x128xf32, #tpu.memory_space<vmem>>, vector<1x1x128xf32>,
    %cst_57 = arith.constant -0.590043604 : f32
    %112 = vector.broadcast %cst_57 : f32 to vector<1x128xf32>
    %113 = arith.mulf %112, %0 : vector<1x128xf32>
    %114 = arith.mulf %113, %63 : vector<1x128xf32>
    %c15 = arith.constant 15 : index
    %c0_58 = arith.constant 0 : index
    %c0_59 = arith.constant 0 : index
    %115 = vector.load %arg4[%c15, %c0_58, %c0_59] : memref<16x1x128xf32, #tpu.memory_space<vmem>>, vector<1x1x128xf32>
    %116 = vector.shape_cast %115 : vector<1x1x128xf32> to vector<1x128xf32>
    %117 = vector.shape_cast %114 : vector<1x128xf32> to vector<1x1x128xf32>
    tpu.vector_store %arg4[%c15, %c0_58, %c0_59], %117 {strides = array<i32>} : memref<16x1x128xf32, #tpu.memory_space<vmem>>, vector<1x1x128xf32>,
    return
  }
  func.func @transform_0(%arg0: i32) -> (i32, i32) {
    %c0_i32 = arith.constant 0 : i32
    %c0_i32_0 = arith.constant 0 : i32
    return %arg0, %c0_i32 : i32, i32
  }
  func.func @transform_1(%arg0: i32) -> (i32, i32) {
    %c0_i32 = arith.constant 0 : i32
    %c0_i32_0 = arith.constant 0 : i32
    return %arg0, %c0_i32 : i32, i32
  }
  func.func @transform_2(%arg0: i32) -> (i32, i32) {
    %c0_i32 = arith.constant 0 : i32
    %c0_i32_0 = arith.constant 0 : i32
    return %arg0, %c0_i32 : i32, i32
  }
  func.func @transform_3(%arg0: i32) -> (i32, i32, i32) {
    %c0_i32 = arith.constant 0 : i32
    %c0_i32_0 = arith.constant 0 : i32
    %c0_i32_1 = arith.constant 0 : i32
    return %c0_i32, %arg0, %c0_i32_0 : i32, i32, i32
  }
}

</mosaic_0001>

<bundles_post_ra>
// kernel: tpu_custom_call.1
= control target key start
LH: loop header
LB: loop body
LE: loop exit
PB: predicated region body
PF: predicated region fallthrough
CT: control target
= control target key end

     0   :  { %8 = vsyncpa [#allocation3], 0  ;;  %s260_s0 = inlined_call_operand.hbm [shape: f32[1,128], index: 0, kind: input, shape index: {}]   ;;  %s261_s1 = inlined_call_operand.hbm [shape: f32[1,128], index: 1, kind: input, shape index: {}]   ;;  %s262_s2 = inlined_call_operand.vmem [shape: f32[1,128], index: 2, kind: input, shape index: {}]   ;;  %s263_s3 = inlined_call_operand.hbm [shape: f32[16,1,128], index: 3, kind: output, shape index: {}]  }
   0x1   :  { %9 = vsyncpa [#allocation6], 0 }
   0x2   :  { %10 = vsyncpa [#allocation4], 0  ;;  %s16_s14 = sshll.u32 %s260_s0, 4  ;;  %s222_s15 = smov [#allocation2]   ;;  %s17_s14 = int_to_ptr.hbm [resolvable:$true] %s16_s14 }
   0x3   :  { %s18_s16 = sshll.u32 %s222_s15, 4  ;;  %s27_s19 = sshll.u32 %s261_s1, 4  ;;  %s19_s16 = int_to_ptr.vmem [resolvable:$true] %s18_s16  ;;  %s28_s19 = int_to_ptr.hbm [resolvable:$true] %s27_s19 }
   0x4   :  { %21 = dma.hbm_to_vmem [thread:$0]  %s17_s14, 16, %s19_s16, [#allocation3]  }
   0x5   :  { %s223_s20 = smov [#allocation5]  }
   0x6   :  { %s29_s21 = sshll.u32 %s223_s20, 4  ;;  %s30_s21 = int_to_ptr.vmem [resolvable:$true] %s29_s21 }
   0x7   :  { %32 = dma.hbm_to_vmem [thread:$0]  %s28_s19, 16, %s30_s21, [#allocation6]  }
   0x8   :  { %216 = dma.done.wait [#allocation3], 16  }
   0x9   :  { %217 = vsyncadd [#allocation3], 4294967280 }
   0xa   :  { %218 = dma.done.wait [#allocation6], 16  }
   0xb   :  { %219 = vsyncadd [#allocation6], 4294967280  ;;  %v224_v0 = vmov 0.2820948   ;;  %v44_v1 = vld [vmem:[#allocation5] sm:$0x1] }
   0xc   :  { %46 = vst [vmem:[#allocation7] sm:$0x1] %v224_v0  ;;  %v45_v2 = vld [vmem:[%s262_s2] sm:$0x1]  ;;  %v47_v4 = vmul.f32 -0.48860252, %v44_v1  ;;  %v57_v10 = vmul.f32 %v44_v1, %v44_v1 }
   0xd   :  { %v43_v3 = vld [vmem:[#allocation2] sm:$0x1]  ;;  %v50_v5 = vmul.f32 0.48860252, %v45_v2  ;;  %v60_v8 = vmul.f32 %v45_v2, %v44_v1  ;;  %v58_v11 = vmul.f32 %v45_v2, %v45_v2  ;;  %v88_v14 = vmul.f32 -0.5900436, %v44_v1 }
   0xe   :  { %v53_v6 = vmul.f32 -0.48860252, %v43_v3  ;;  %v59_v7 = vmul.f32 %v44_v1, %v43_v3  ;;  %v56_v9 = vmul.f32 %v43_v3, %v43_v3  ;;  %49 = vst [vmem:[#allocation7 + $0x1] sm:$0x1] %v47_v4  ;;  %v61_v13 = vmul.f32 %v45_v2, %v43_v3  ;;  %s225_s1 = smov [#allocation7]   ;;  %s124_s25 = sshll.u32 %s263_s3, 4  ;;  %s125_s25 = int_to_ptr.hbm [resolvable:$true] %s124_s25 }
   0xf   :  { %52 = vst [vmem:[#allocation7 + $0x2] sm:$0x1] %v50_v5  ;;  %v66_v15 = vmul.f32 -1.0925485, %v60_v8  ;;  %v69_v16 = vmul.f32 2.0, %v58_v11  ;;  %v85_v24 = vmul.f32 4.0, %v58_v11 }
  0x10   :  { %v63_v12 = vmul.f32 1.0925485, %v59_v7  ;;  %v62_v17 = vsub.f32 %v56_v9, %v57_v10  ;;  %v81_v18 = vmul.f32 3.0, %v56_v9  ;;  %55 = vst [vmem:[#allocation7 + $0x3] sm:$0x1] %v53_v6  ;;  %v83_v27 = vmul.f32 3.0, %v57_v10 }
  0x11   :  { %v75_v19 = vmul.f32 -1.0925485, %v61_v13  ;;  %v92_v20 = vmul.f32 2.8906114, %v59_v7  ;;  %v70_v21 = vsub.f32 %v69_v16, %v56_v9  ;;  %68 = vst [vmem:[#allocation7 + $0x5] sm:$0x1] %v66_v15  ;;  %v86_v31 = vsub.f32 %v85_v24, %v56_v9 }
  0x12   :  { %65 = vst [vmem:[#allocation7 + $0x4] sm:$0x1] %v63_v12  ;;  %v78_v22 = vmul.f32 0.54627424, %v62_v17  ;;  %v82_v23 = vsub.f32 %v81_v18, %v57_v10  ;;  %v96_v26 = vmul.f32 -0.4570458, %v44_v1  ;;  %v101_v28 = vsub.f32 %v69_v16, %v81_v18 }
  0x13   :  { %v93_v25 = vmul.f32 %v92_v20, %v45_v2  ;;  %v71_v29 = vsub.f32 %v70_v21, %v57_v10  ;;  %77 = vst [vmem:[#allocation7 + $0x7] sm:$0x1] %v75_v19  ;;  %v100_v32 = vmul.f32 0.37317634, %v45_v2  ;;  %v106_v34 = vmul.f32 -0.4570458, %v43_v3 }
  0x14   :  { %v89_v30 = vmul.f32 %v88_v14, %v82_v23  ;;  %80 = vst [vmem:[#allocation7 + $0x8] sm:$0x1] %v78_v22  ;;  %v102_v33 = vsub.f32 %v101_v28, %v83_v27  ;;  %v110_v35 = vmul.f32 1.4453057, %v45_v2  ;;  %v84_v36 = vsub.f32 %v56_v9, %v83_v27  ;;  %s122_s2 = sshll.u32 %s225_s1, 4  ;;  %s226_s26 = smov 16   ;;  %s123_s2 = int_to_ptr.vmem [resolvable:$true] %s122_s2 }
  0x15   :  { %v72_v37 = vmul.f32 0.31539157, %v71_v29  ;;  %v87_v38 = vsub.f32 %v86_v31, %v57_v10  ;;  %v114_v39 = vmul.f32 -0.5900436, %v43_v3  ;;  %95 = vst [vmem:[#allocation7 + $0xa] sm:$0x1] %v93_v25 }
  0x16   :  { %91 = vst [vmem:[#allocation7 + $0x9] sm:$0x1] %v89_v30  ;;  %v103_v40 = vmul.f32 %v102_v33, %v100_v32  ;;  %v111_v43 = vmul.f32 %v110_v35, %v62_v17  ;;  %s227_s27 = smov 1  }
  0x17   :  { %74 = vst [vmem:[#allocation7 + $0x6] sm:$0x1] %v72_v37  ;;  %v97_v41 = vmul.f32 %v96_v26, %v87_v38  ;;  %v107_v42 = vmul.f32 %v106_v34, %v87_v38  ;;  %v115_v44 = vmul.f32 %v114_v39, %v84_v36 }
  0x18   :  { %105 = vst [vmem:[#allocation7 + $0xc] sm:$0x1] %v103_v40 }
  0x19   :  { %99 = vst [vmem:[#allocation7 + $0xb] sm:$0x1] %v97_v41 }
  0x1a   :  { %109 = vst [vmem:[#allocation7 + $0xd] sm:$0x1] %v107_v42 }
  0x1b   :  { %113 = vst [vmem:[#allocation7 + $0xe] sm:$0x1] %v111_v43 }
  0x1c   :  { %117 = vst [vmem:[#allocation7 + $0xf] sm:$0x1] %v115_v44 }
  0x1d   :  { %130 = dma.vmem_to_hbm [thread:$0]  %s123_s2, 256, %s125_s25, [#allocation4], %s226_s26, %s226_s26, %s227_s27  }
  0x1e   :  { %220 = dma.done.wait [#allocation4], 256  }
  0x1f   :  { %221 = vsyncadd [#allocation4], 4294967040 }
  0x20   :  { %135 = vsyncpa [#allocation3], 1 }
  0x21   :  { %136 = vsyncpa [#allocation6], 1 }
  0x22   :  { %137 = vsyncpa [#allocation4], 1 }

</bundles_post_ra>
